<compile_context>
chip_gen: v5e
topology: v5e:2x2
jax: 0.10.0
libtpu: 0.0.40
codegen_flags: <defaults>
</compile_context>

<pallas_src>
import jax
import jax.numpy as jnp
from jax.experimental import pallas as pl
from jax.experimental.pallas import tpu as pltpu

BN_EPS = 1e-3  # BatchNorm1d(eps=0.001)


# ---------------------------------------------------------------------------
# Pallas kernel: fused Linear (GEMM) + BatchNorm1d (batch stats) + ReLU
# ---------------------------------------------------------------------------
def linear_bn_relu_kernel(x_ref, w_ref, gb_ref, o_ref):
    # MXU GEMM: bf16 operands (cast in-register), f32 accumulation.
    x_bf = x_ref[...].astype(jnp.bfloat16)          # (N, in)
    w_bf = w_ref[...].astype(jnp.bfloat16)          # (in, out)
    y = jnp.dot(x_bf, w_bf, preferred_element_type=jnp.float32)  # (N, out) f32

    # NOTE: the Linear bias is intentionally NOT added — it is a per-feature constant
    # and cancels exactly under batch-statistic BatchNorm (y - mean).

    # Batch statistics over the batch dimension (biased variance, as torch BN uses
    # for normalization).
    mean = jnp.mean(y, axis=0, keepdims=True)                       # (1, out)
    var = jnp.mean(jnp.square(y - mean), axis=0, keepdims=True)     # (1, out)

    gamma = gb_ref[0:1, :]                                          # (1, out)
    beta = gb_ref[1:2, :]                                           # (1, out)

    # Fold normalize + affine into a single scale/shift FMA; rsqrt -> EUP.
    scale = gamma * jax.lax.rsqrt(var + BN_EPS)
    shift = beta - mean * scale
    o_ref[...] = jnp.maximum(y * scale + shift, 0.0)


# ---------------------------------------------------------------------------
# Wrapper
# ---------------------------------------------------------------------------
def linear_block(x, w, b, gamma, beta):
    """LinearBlock forward: ReLU(BatchNorm1d(Linear(x))) with batch statistics.

    x:     (N, in_features)  float32
    w:     (out, in)  torch Linear weight layout
    b:     (out,)     Linear bias — accepted for API fidelity; it is mathematically
                      a no-op under batch-stat BatchNorm, so it is not used.
    gamma: (out,)     BN weight
    beta:  (out,)     BN bias
    """
    del b  # cancels exactly in (y - mean); see kernel comment.
    n, d_in = x.shape
    d_out = w.shape[0]
    assert w.shape == (d_out, d_in)

    wt = jnp.transpose(w).astype(jnp.float32)            # (in, out) MXU layout
    gb = jnp.stack(
        [gamma.astype(jnp.float32), beta.astype(jnp.float32)], axis=0
    )                                                     # (2, out) single VMEM tile

    return pl.pallas_call(
        linear_bn_relu_kernel,
        out_shape=jax.ShapeDtypeStruct((n, d_out), jnp.float32),
        in_specs=[
            pl.BlockSpec(memory_space=pltpu.MemorySpace.VMEM),  # x
            pl.BlockSpec(memory_space=pltpu.MemorySpace.VMEM),  # w^T
            pl.BlockSpec(memory_space=pltpu.MemorySpace.VMEM),  # gamma/beta
        ],
        out_specs=pl.BlockSpec(memory_space=pltpu.MemorySpace.VMEM),
    )(x.astype(jnp.float32), wt, gb)


# ---------------------------------------------------------------------------
# Demo / correctness check
# ---------------------------------------------------------------------------
if __name__ == "__main__":
    key = jax.random.PRNGKey(0)
    # Small but lane/sublane-dense shapes: batch multiple of 8, out multiple of 128.
    N, D_IN, D_OUT = 8, 256, 128

    kx, kw, kg, kb = jax.random.split(key, 4)
    x = jax.random.normal(kx, (N, D_IN), jnp.float32)
    # Emulate truncated_normal_(std=0.01): clipped normal * 0.01 (init detail only).
    w = jnp.clip(jax.random.normal(kw, (D_OUT, D_IN), jnp.float32), -2.0, 2.0) * 0.01
    b = jnp.zeros((D_OUT,), jnp.float32)              # fc_init_ sets bias to 0
    gamma = 1.0 + 0.1 * jax.random.normal(kg, (D_OUT,), jnp.float32)
    beta = 0.1 * jax.random.normal(kb, (D_OUT,), jnp.float32)

    out = linear_block(x, w, b, gamma, beta)
    out = jax.block_until_ready(out)

    # Plain-JAX f32 reference of the exact module semantics (bias + explicit BN).
    y_ref = x @ w.T + b
    m = jnp.mean(y_ref, axis=0, keepdims=True)
    v = jnp.mean(jnp.square(y_ref - m), axis=0, keepdims=True)
    ref = jnp.maximum((y_ref - m) * jax.lax.rsqrt(v + BN_EPS) * gamma + beta, 0.0)

    assert out.shape == (N, D_OUT)
    max_err = float(jnp.max(jnp.abs(out - ref)))
    assert max_err < 1e-1, f"max |err| = {max_err}"   # bf16 GEMM operands vs f32 ref
    print("KERNEL_OK")
</pallas_src>

<mosaic_0001>
module attributes {stable_mosaic.version = 11 : i64} {
  func.func @linear_bn_relu_kernel(%arg0: memref<8x256xf32, #tpu.memory_space<vmem>>, %arg1: memref<256x128xf32, #tpu.memory_space<vmem>>, %arg2: memref<2x128xf32, #tpu.memory_space<vmem>>, %arg3: memref<8x128xf32, #tpu.memory_space<vmem>>) attributes {dimension_semantics = [], scalar_prefetch = 0 : i64, scratch_operands = 0 : i64, tpu.core_type = #tpu.core_type<tc>} {
    %c0 = arith.constant 0 : index
    %c0_0 = arith.constant 0 : index
    %0 = vector.load %arg0[%c0, %c0_0] : memref<8x256xf32, #tpu.memory_space<vmem>>, vector<8x256xf32>
    %1 = arith.truncf %0 : vector<8x256xf32> to vector<8x256xbf16>
    %c0_1 = arith.constant 0 : index
    %c0_2 = arith.constant 0 : index
    %2 = vector.load %arg1[%c0_1, %c0_2] : memref<256x128xf32, #tpu.memory_space<vmem>>, vector<256x128xf32>
    %3 = arith.truncf %2 : vector<256x128xf32> to vector<256x128xbf16>
    %cst = arith.constant dense<0.000000e+00> : vector<8x128xf32>
    %4 = tpu.matmul %1, %3, %cst {dimension_numbers = #tpu.dot_dimension_numbers<[1], [0], [0], [1], [0, 0, 1, 1], [], []>} : vector<8x256xbf16>, vector<256x128xbf16>, vector<8x128xf32> -> vector<8x128xf32>
    %cst_3 = arith.constant dense<0.000000e+00> : vector<128xf32>
    %5 = vector.multi_reduction <add>, %4, %cst_3 [0] : vector<8x128xf32> to vector<128xf32>
    %6 = vector.shape_cast %5 : vector<128xf32> to vector<1x128xf32>
    %cst_4 = arith.constant 8.000000e+00 : f32
    %7 = vector.broadcast %cst_4 : f32 to vector<1x128xf32>
    %8 = arith.divf %6, %7 : vector<1x128xf32>
    %9 = vector.broadcast %8 : vector<1x128xf32> to vector<8x128xf32>
    %10 = arith.subf %4, %9 : vector<8x128xf32>
    %11 = arith.mulf %10, %10 : vector<8x128xf32>
    %cst_5 = arith.constant dense<0.000000e+00> : vector<128xf32>
    %12 = vector.multi_reduction <add>, %11, %cst_5 [0] : vector<8x128xf32> to vector<128xf32>
    %13 = vector.shape_cast %12 : vector<128xf32> to vector<1x128xf32>
    %cst_6 = arith.constant 8.000000e+00 : f32
    %14 = vector.broadcast %cst_6 : f32 to vector<1x128xf32>
    %15 = arith.divf %13, %14 : vector<1x128xf32>
    %c0_7 = arith.constant 0 : index
    %c0_8 = arith.constant 0 : index
    %16 = vector.load %arg2[%c0_7, %c0_8] : memref<2x128xf32, #tpu.memory_space<vmem>>, vector<1x128xf32>
    %c1 = arith.constant 1 : index
    %c0_9 = arith.constant 0 : index
    %17 = vector.load %arg2[%c1, %c0_9] : memref<2x128xf32, #tpu.memory_space<vmem>>, vector<1x128xf32>
    %cst_10 = arith.constant 1.000000e-03 : f32
    %18 = vector.broadcast %cst_10 : f32 to vector<1x128xf32>
    %19 = arith.addf %15, %18 : vector<1x128xf32>
    %20 = math.rsqrt %19 : vector<1x128xf32>
    %21 = arith.mulf %16, %20 : vector<1x128xf32>
    %22 = arith.mulf %8, %21 : vector<1x128xf32>
    %23 = arith.subf %17, %22 : vector<1x128xf32>
    %24 = vector.broadcast %21 : vector<1x128xf32> to vector<8x128xf32>
    %25 = arith.mulf %4, %24 : vector<8x128xf32>
    %26 = vector.broadcast %23 : vector<1x128xf32> to vector<8x128xf32>
    %27 = arith.addf %25, %26 : vector<8x128xf32>
    %cst_11 = arith.constant 0.000000e+00 : f32
    %28 = vector.broadcast %cst_11 : f32 to vector<8x128xf32>
    %29 = arith.maximumf %27, %28 : vector<8x128xf32>
    %c0_12 = arith.constant 0 : index
    %c0_13 = arith.constant 0 : index
    %30 = vector.load %arg3[%c0_12, %c0_13] : memref<8x128xf32, #tpu.memory_space<vmem>>, vector<8x128xf32>
    tpu.vector_store %arg3[%c0_12, %c0_13], %29 {strides = array<i32>} : memref<8x128xf32, #tpu.memory_space<vmem>>, vector<8x128xf32>,
    return
  }
}

</mosaic_0001>

<bundles_post_ra>
// kernel: tpu_custom_call.1
= control target key start
LH: loop header
LB: loop body
LE: loop exit
PB: predicated region body
PF: predicated region fallthrough
CT: control target
= control target key end

     0   :  { %8 = vsyncpa [#allocation3], 0  ;;  %s351_s0 = inlined_call_operand.hbm [shape: f32[8,256], index: 0, kind: input, shape index: {}]   ;;  %s352_s1 = inlined_call_operand.hbm [shape: f32[256,128], index: 1, kind: input, shape index: {}]   ;;  %s353_s2 = inlined_call_operand.hbm [shape: f32[2,128], index: 2, kind: input, shape index: {}]   ;;  %s354_s3 = inlined_call_operand.hbm [shape: f32[8,128], index: 3, kind: output, shape index: {}]  }
   0x1   :  { %9 = vsyncpa [#allocation6], 0  ;;  %s26_s14 = sshll.u32 %s352_s1, 4  ;;  %s27_s14 = int_to_ptr.hbm [resolvable:$true] %s26_s14 }
   0x2   :  { %10 = vsyncpa [#allocation4], 0  ;;  %s312_s15 = smov [#allocation5]   ;;  %s16_s19 = sshll.u32 %s351_s0, 4  ;;  %s17_s19 = int_to_ptr.hbm [resolvable:$true] %s16_s19 }
   0x3   :  { %s28_s16 = sshll.u32 %s312_s15, 4  ;;  %s313_s20 = smov 128   ;;  %s29_s16 = int_to_ptr.vmem [resolvable:$true] %s28_s16 }
   0x4   :  { %s314_s21 = smov 8   ;;  %s315_s22 = smov [#allocation2]  }
   0x5   :  { %34 = dma.hbm_to_vmem [thread:$0]  %s27_s14, 4096, %s29_s16, [#allocation6], %s313_s20, %s313_s20, %s314_s21  }
   0x6   :  { %s18_s23 = sshll.u32 %s315_s22, 4  ;;  %s40_s26 = sshll.u32 %s353_s2, 4  ;;  %s19_s23 = int_to_ptr.vmem [resolvable:$true] %s18_s23  ;;  %s41_s26 = int_to_ptr.hbm [resolvable:$true] %s40_s26 }
   0x7   :  { %21 = dma.hbm_to_vmem [thread:$0]  %s17_s19, 256, %s19_s23, [#allocation3]  }
   0x8   :  { %s316_s1 = smov [#allocation7]  }
   0x9   :  { %s42_s27 = sshll.u32 %s316_s1, 4  ;;  %s43_s27 = int_to_ptr.vmem [resolvable:$true] %s42_s27 }
   0xa   :  { %45 = dma.hbm_to_vmem [thread:$0]  %s41_s26, 32, %s43_s27, [#allocation6]  }
   0xb   :  { %306 = dma.done.wait [#allocation3], 256  }
   0xc   :  { %307 = vsyncadd [#allocation3], 4294967040 }
   0xd   :  { %308 = dma.done.wait [#allocation6], 4128  }
   0xe   :  { %309 = vsyncadd [#allocation6], 4294963168  ;;  %v76_v0 = vld [vmem:[#allocation5 + $0x70] sm:$0xff]  ;;  %v77_v1 = vld [vmem:[#allocation5 + $0x78] sm:$0xff]  ;;  %v317_v52 = vmov 8.0   ;;  %s318_s0 = smov [#allocation8]  }
   0xf   :  { %v92_v2 = vld [vmem:[#allocation5 + $0xf0] sm:$0xff]  ;;  %v101_v3 = vpack.c.bf16 %v77_v1, %v76_v0  ;;  %v93_v4 = vld [vmem:[#allocation5 + $0xf8] sm:$0xff]  ;;  %v74_v5 = vld [vmem:[#allocation5 + $0x60] sm:$0xff]  ;;  %206 = vrcp.f32 %v317_v52  ;;  %s186_s2 = sshll.u32 %s318_s0, 4  ;;  %s188_s30 = sshll.u32 %s354_s3, 4  ;;  %s187_s2 = int_to_ptr.vmem [resolvable:$true] %s186_s2  ;;  %s189_s30 = int_to_ptr.hbm [resolvable:$true] %s188_s30 }
  0x10   :  { %v75_v6 = vld [vmem:[#allocation5 + $0x68] sm:$0xff]  ;;  %v109_v7 = vpack.c.bf16 %v93_v4, %v92_v2  ;;  %v90_v8 = vld [vmem:[#allocation5 + $0xe0] sm:$0xff]  ;;  %v72_v12 = vld [vmem:[#allocation5 + $0x50] sm:$0xff] }
  0x11   :  { %v91_v9 = vld [vmem:[#allocation5 + $0xe8] sm:$0xff]  ;;  %110 = vmatpush.bf16.msra.mxu0 %v101_v3  ;;  %v100_v10 = vpack.c.bf16 %v75_v6, %v74_v5  ;;  %v73_v13 = vld [vmem:[#allocation5 + $0x58] sm:$0xff]  ;;  %v88_v14 = vld [vmem:[#allocation5 + $0xd0] sm:$0xff] }
  0x12   :  { %123 = vmatpush.bf16.msra.mxu1 %v109_v7  ;;  %v108_v11 = vpack.c.bf16 %v91_v9, %v90_v8  ;;  %v89_v15 = vld [vmem:[#allocation5 + $0xd8] sm:$0xff]  ;;  %v99_v16 = vpack.c.bf16 %v73_v13, %v72_v12  ;;  %v70_v18 = vld [vmem:[#allocation5 + $0x40] sm:$0xff]  ;;  %v71_v19 = vld [vmem:[#allocation5 + $0x48] sm:$0xff] }
  0x13   :  { %v107_v17 = vpack.c.bf16 %v89_v15, %v88_v14  ;;  %v86_v20 = vld [vmem:[#allocation5 + $0xc0] sm:$0xff]  ;;  %v87_v21 = vld [vmem:[#allocation5 + $0xc8] sm:$0xff]  ;;  %v98_v22 = vpack.c.bf16 %v71_v19, %v70_v18  ;;  %v68_v24 = vld [vmem:[#allocation5 + $0x30] sm:$0xff] }
  0x14   :  { %v106_v23 = vpack.c.bf16 %v87_v21, %v86_v20  ;;  %v69_v25 = vld [vmem:[#allocation5 + $0x38] sm:$0xff]  ;;  %v84_v26 = vld [vmem:[#allocation5 + $0xb0] sm:$0xff]  ;;  %v66_v30 = vld [vmem:[#allocation5 + $0x20] sm:$0xff] }
  0x15   :  { %111 = vmatpush.bf16.msra.mxu0 %v100_v10  ;;  %v85_v27 = vld [vmem:[#allocation5 + $0xb8] sm:$0xff]  ;;  %v97_v28 = vpack.c.bf16 %v69_v25, %v68_v24  ;;  %v67_v31 = vld [vmem:[#allocation5 + $0x28] sm:$0xff]  ;;  %v82_v32 = vld [vmem:[#allocation5 + $0xa0] sm:$0xff]  ;;  %v207_v53 = vpop.eup %206 }
  0x16   :  { %124 = vmatpush.bf16.msra.mxu1 %v108_v11  ;;  %v105_v29 = vpack.c.bf16 %v85_v27, %v84_v26  ;;  %v83_v33 = vld [vmem:[#allocation5 + $0xa8] sm:$0xff]  ;;  %v96_v34 = vpack.c.bf16 %v67_v31, %v66_v30  ;;  %v64_v36 = vld [vmem:[#allocation5 + $0x10] sm:$0xff]  ;;  %v65_v37 = vld [vmem:[#allocation5 + $0x18] sm:$0xff]  ;;  %v143_v54 = vmul.f32 8.0, %v207_v53  ;;  %vm147_vm0 = vweird.f32 %v207_v53 }
  0x17   :  { %v104_v35 = vpack.c.bf16 %v83_v33, %v82_v32  ;;  %v80_v38 = vld [vmem:[#allocation5 + $0x90] sm:$0xff]  ;;  %v81_v39 = vld [vmem:[#allocation5 + $0x98] sm:$0xff]  ;;  %v95_v40 = vpack.c.bf16 %v65_v37, %v64_v36  ;;  %v62_v42 = vld [vmem:[#allocation5] sm:$0xff] }
  0x18   :  { %v103_v41 = vpack.c.bf16 %v81_v39, %v80_v38  ;;  %v63_v43 = vld [vmem:[#allocation5 + $0x8] sm:$0xff]  ;;  %v78_v44 = vld [vmem:[#allocation5 + $0x80] sm:$0xff]  ;;  %v58_v47 = vld [vmem:[#allocation2] sm:$0xff]  ;;  %v144_v57 = vsub.f32 1.0, %v143_v54 }
  0x19   :  { %112 = vmatpush.bf16.msra.mxu0 %v99_v16  ;;  %v79_v45 = vld [vmem:[#allocation5 + $0x88] sm:$0xff]  ;;  %v94_v46 = vpack.c.bf16 %v63_v43, %v62_v42  ;;  %v59_v49 = vld [vmem:[#allocation2 + $0x8] sm:$0xff]  ;;  %v60_v50 = vpack.c.bf16 %v58_v47, %v58_v47  ;;  %v160_v26 = vld [vmem:[#allocation7 + $0x1] sm:$0x1] }
  0x1a   :  { %125 = vmatpush.bf16.msra.mxu1 %v107_v17  ;;  %v102_v48 = vpack.c.bf16 %v79_v45, %v78_v44  ;;  %v61_v51 = vpack.c.bf16 %v59_v49, %v59_v49  ;;  %v145_v60 = vmul.f32 %v207_v53, %v144_v57 }
  0x1c   :  { %v146_v0 = vadd.f32 %v207_v53, %v145_v60 }
  0x1d   :  { %113 = vmatpush.bf16.msra.mxu0 %v98_v22  ;;  %v159_v22 = vld [vmem:[#allocation7] sm:$0x1] }
  0x1e   :  { %126 = vmatpush.bf16.msra.mxu1 %v106_v23  ;;  %v148_v4 = vsel %vm147_vm0, %v207_v53, %v146_v0 }
  0x21   :  { %114 = vmatpush.bf16.msra.mxu0 %v97_v28 }
  0x22   :  { %127 = vmatpush.bf16.msra.mxu1 %v105_v29 }
  0x25   :  { %115 = vmatpush.bf16.msra.mxu0 %v96_v34 }
  0x26   :  { %128 = vmatpush.bf16.msra.mxu1 %v104_v35 }
  0x29   :  { %116 = vmatpush.bf16.msra.mxu0 %v95_v40 }
  0x2a   :  { %129 = vmatpush.bf16.msra.mxu1 %v103_v41 }
  0x2d   :  { %117 = vmatpush.bf16.msra.mxu0 %v94_v46 }
  0x2e   :  { %130 = vmatpush.bf16.msra.mxu1 %v102_v48 }
  0x30   :  { %118 = vmatmul.bf16.vlgmr.msra.gmra.mxu0 %v60_v50 }
  0x31   :  { %131 = vmatmul.bf16.vlgmr.msra.gmra.mxu1 %v61_v51 }
  0xad   :  { %v119_v55 = vpop.f32.mrf.mxu0 }
  0xae   :  { %v132_v56 = vpop.f32.mrf.mxu1 }
  0xaf   :  { %v133_v58 = vadd.f32 %v132_v56, %v119_v55 }
  0xb1   :  { %v136_v59 = vrot.slane %v133_v58, 4 }
  0xb3   :  { %v137_v61 = vadd.f32 %v136_v59, %v133_v58 }
  0xb5   :  { %v138_v62 = vrot.slane %v137_v61, 2  ;;  %v121_v63 = vpop.f32.mrf.mxu0 }
  0xb6   :  { %v134_v1 = vpop.f32.mrf.mxu1 }
  0xb7   :  { %v139_v2 = vadd.f32 %v138_v62, %v137_v61 }
  0xb9   :  { %v140_v3 = vrot.slane %v139_v2, 1 }
  0xbb   :  { %v141_v5 = vadd.f32 %v140_v3, %v139_v2 }
  0xbd   :  { %v149_v6 = vmul.f32 %v148_v4, %v141_v5 }
  0xbf   :  { %v150_v7 = vsub.f32 %v133_v58, %v149_v6 }
  0xc1   :  { %v151_v8 = vmul.f32 %v150_v7, %v150_v7 }
  0xc3   :  { %v152_v9 = vrot.slane %v151_v8, 4 }
  0xc5   :  { %v153_v10 = vadd.f32 %v152_v9, %v151_v8 }
  0xc7   :  { %v154_v11 = vrot.slane %v153_v10, 2 }
  0xc9   :  { %v155_v12 = vadd.f32 %v154_v11, %v153_v10 }
  0xcb   :  { %v156_v13 = vrot.slane %v155_v12, 1 }
  0xcd   :  { %v157_v14 = vadd.f32 %v156_v13, %v155_v12 }
  0xcf   :  { %v158_v15 = vmul.f32 %v157_v14, %v148_v4 }
  0xd1   :  { %v161_v16 = vadd.f32 0.001, %v158_v15 }
  0xd3   :  { %208 = vrsqrt.f32 %v161_v16  ;;  %vm168_vm2 = vweird.f32 %v161_v16 }
  0xd9   :  { %v209_v17 = vpop.eup %208 }
  0xda   :  { %v163_v18 = vmul.f32 %v209_v17, %v161_v16  ;;  %vm169_vm1 = vweird.f32 %v209_v17 }
  0xdb   :  { %vm170_vm3 = vmor %vm168_vm2, %vm169_vm1 }
  0xdc   :  { %v164_v19 = vmul.f32 %v209_v17, %v163_v18 }
  0xde   :  { %v165_v20 = vmul.f32 0.5, %v164_v19 }
  0xe0   :  { %v166_v21 = vsub.f32 1.5, %v165_v20 }
  0xe2   :  { %v167_v23 = vmul.f32 %v209_v17, %v166_v21 }
  0xe4   :  { %v171_v24 = vsel %vm170_vm3, %v209_v17, %v167_v23 }
  0xe5   :  { %v172_v25 = vmul.f32 %v171_v24, %v159_v22 }
  0xe7   :  { %v173_v27 = vmul.f32 %v172_v25, %v149_v6  ;;  %v175_v28 = vperm.slane %v172_v25, 0 }
  0xe9   :  { %v174_v29 = vsub.f32 %v160_v26, %v173_v27  ;;  %v176_v30 = vmul.f32 %v175_v28, %v133_v58 }
  0xeb   :  { %v177_v31 = vperm.slane %v174_v29, 0 }
  0xed   :  { %v178_v32 = vadd.f32 %v177_v31, %v176_v30 }
  0xef   :  { %v179_v33 = vmax.f32 %v178_v32, 0.0 }
  0xf1   :  { %180 = vst [vmem:[#allocation8] sm:$0xff] %v179_v33 }
  0xf2   :  { %191 = dma.vmem_to_hbm [thread:$0]  %s187_s2, 128, %s189_s30, [#allocation4]  }
  0xf3   :  { %310 = dma.done.wait [#allocation4], 128  }
  0xf4   :  { %311 = vsyncadd [#allocation4], 4294967168 }
  0xf5   :  { %196 = vsyncpa [#allocation3], 1 }
  0xf6   :  { %197 = vsyncpa [#allocation6], 1 }
  0xf7   :  { %198 = vsyncpa [#allocation4], 1 }

</bundles_post_ra>
